<compile_context>
chip_gen: v5e
topology: v5e:2x2
jax: 0.10.0
libtpu: 0.0.40
codegen_flags: <defaults>
</compile_context>

<pallas_src>
import jax
import jax.numpy as jnp
from jax import lax
from jax.experimental import pallas as pl
from jax.experimental.pallas import tpu as pltpu

NUM_MOVES = 64        # vocabulary of move tokens (after the +1 shift)
OFFSET = 128          # len(schema['movedex']['basePower']) analogue
EMB_DIM = 256         # full MoveEmbedding width (>= OFFSET)
NUM_MON_MOVES = 4     # 4 move slots per active mon
N_MONS = 6            # party size
N_FEATS = 18          # private_reserve feature width (last 8 = 4 x (token, pp))
PR_FLAT = N_MONS * N_FEATS


def _max_damage_kernel(pr_ref, mask_ref, bp_ref, out_ref):
    """pr_ref:   SMEM (B, PR_FLAT) i32  -- raw private_reserve rows (no +1),
       mask_ref: SMEM (B, 4) i32        -- move mask,
       bp_ref:   SMEM (NUM_MOVES,) f32  -- precomputed per-token max damage,
       out_ref:  SMEM (B, 1) i32        -- chosen move slot per decision."""
    batch = out_ref.shape[0]
    for b in range(batch):                                # tiny B, static unroll
        # --- active mon: first m with private_reserve[..., 1] + 1 == 2 ---
        def scan_mon(m, found):
            is_act = (pr_ref[b, m * N_FEATS + 1] + 1) == 2
            return jnp.where((found < 0) & is_act, m, found)

        active = lax.fori_loop(0, N_MONS, scan_mon, jnp.int32(-1))
        active = jnp.maximum(active, 0)                   # no active mon -> mon 0
        base = active * N_FEATS + (N_FEATS - 8)           # start of 4 (token, pp) pairs

        # --- per-slot max damage, masked_fill(-1), running argmax ---
        best_val = jnp.float32(-jnp.inf)
        best_idx = jnp.int32(0)
        for s in range(NUM_MON_MOVES):
            tok = pr_ref[b, base + 2 * s] + 1             # +1 token shift
            tok = jnp.minimum(jnp.maximum(tok, 0), NUM_MOVES - 1)
            val = bp_ref[tok]                             # scalar SMEM gather
            val = jnp.where(mask_ref[b, s] != 0, val, jnp.float32(-1.0))
            take = val > best_val                         # strict '>' == first-occurrence tie-break
            best_idx = jnp.where(take, jnp.int32(s), best_idx)
            best_val = jnp.where(take, val, best_val)
        out_ref[b, 0] = best_idx


def max_damage_choose(pr_flat, mask, per_token_bp):
    """pr_flat: (B, PR_FLAT) i32, mask: (B, 4) i32, per_token_bp: (NUM_MOVES,) f32.
       Returns (B, 1) i32 chosen move slot per decision.  Single launch, all SMEM."""
    batch = pr_flat.shape[0]
    return pl.pallas_call(
        _max_damage_kernel,
        out_shape=jax.ShapeDtypeStruct((batch, 1), jnp.int32),
        in_specs=[
            pl.BlockSpec(memory_space=pltpu.SMEM),   # private_reserve rows (scalars)
            pl.BlockSpec(memory_space=pltpu.SMEM),   # move mask (scalars)
            pl.BlockSpec(memory_space=pltpu.SMEM),   # per-token max damage (256 B)
        ],
        out_specs=pl.BlockSpec(memory_space=pltpu.SMEM),
    )(pr_flat, mask, per_token_bp)


def precompute_per_token_bp(emb_table, base_powers):
    """Parameter-only hoist: (emb[..., :OFFSET] * basePowers).max(-1), shape (NUM_MOVES,)."""
    return (emb_table[:, :OFFSET] * base_powers.reshape(1, OFFSET)).max(-1)


def max_damage_forward(private_reserve, move_mask, per_token_bp):
    """Single decision; mirrors MaxDamageModel.forward numeric path.

    Note: if no mon is active this picks mon 0 (documented); out-of-range move
    tokens are clamped to valid rows (same as the previous revision)."""
    pr_flat = private_reserve.reshape(1, PR_FLAT).astype(jnp.int32)
    mask = move_mask.reshape(1, NUM_MON_MOVES).astype(jnp.int32)
    idx = max_damage_choose(pr_flat, mask, per_token_bp)
    return idx[0, 0]


def max_damage_forward_ref(private_reserve, move_mask, emb_table, base_powers):
    """Pure-jnp reference for correctness checking (uses the full emb table)."""
    pr_x = private_reserve.reshape(N_MONS, N_FEATS) + 1
    active_idx = jnp.argmax(pr_x[:, 1] == 2)
    moves = pr_x[active_idx][-8:].reshape(NUM_MON_MOVES, 2)
    toks = jnp.clip(moves[:, 0].astype(jnp.int32), 0, NUM_MOVES - 1)
    emb = emb_table[toks][:, :OFFSET]                    # (4, OFFSET)
    bp = (emb * base_powers.reshape(1, OFFSET)).max(-1)  # (4,)
    bp = jnp.where(move_mask.reshape(NUM_MON_MOVES), bp, jnp.float32(-1.0))
    return jnp.argmax(bp).astype(jnp.int32)


if __name__ == "__main__":
    key = jax.random.PRNGKey(0)
    k_bins, k_rest, k_bp, k_pr, k_mask = jax.random.split(key, 5)

    # ---- deterministic "parameters" (MoveEmbedding + basePowers) ----
    bins = jax.random.randint(k_bins, (NUM_MOVES,), 0, OFFSET)
    emb_bp = jax.nn.one_hot(bins, OFFSET, dtype=jnp.float32)            # (NUM_MOVES, OFFSET)
    emb_rest = jax.random.uniform(k_rest, (NUM_MOVES, EMB_DIM - OFFSET),
                                  dtype=jnp.float32)
    emb_table = jnp.concatenate([emb_bp, emb_rest], axis=-1)            # (NUM_MOVES, EMB_DIM)
    base_powers = jax.random.uniform(k_bp, (1, OFFSET), dtype=jnp.float32,
                                     minval=0.0, maxval=250.0)

    # Parameter prep (done once, not per decision): per-token max damage scalar.
    per_token_bp = precompute_per_token_bp(emb_table, base_powers)      # (NUM_MOVES,) f32

    # ---- deterministic example state: single decision ----
    private_reserve = jax.random.randint(
        k_pr, (1, N_MONS, N_FEATS), 0, NUM_MOVES - 2, dtype=jnp.int32)
    private_reserve = private_reserve.at[:, :, 1].set(0)
    private_reserve = private_reserve.at[0, 2, 1].set(1)   # mon 2 is active
    move_mask = jnp.array([[True, True, False, True]])     # (1, 4) bool

    idx = max_damage_forward(private_reserve, move_mask, per_token_bp)
    jax.block_until_ready(idx)
    idx_ref = max_damage_forward_ref(private_reserve[0], move_mask,
                                     emb_table, base_powers)
    assert int(idx) == int(idx_ref), (int(idx), int(idx_ref))

    # ---- batched decisions: one launch, amortized dispatch ----
    B = 4
    k_prb, k_act, k_maskb = jax.random.split(jax.random.PRNGKey(1), 3)
    pr_b = jax.random.randint(k_prb, (B, N_MONS, N_FEATS), 0, NUM_MOVES - 2,
                              dtype=jnp.int32)
    pr_b = pr_b.at[:, :, 1].set(0)
    act_mons = jax.random.randint(k_act, (B,), 0, N_MONS)
    pr_b = pr_b.at[jnp.arange(B), act_mons, 1].set(1)       # one active mon per row
    mask_b = jax.random.bernoulli(k_maskb, 0.7, (B, NUM_MON_MOVES))
    mask_b = mask_b.at[:, 0].set(True)                      # at least one legal move

    out_b = max_damage_choose(pr_b.reshape(B, PR_FLAT),
                              mask_b.astype(jnp.int32), per_token_bp)
    jax.block_until_ready(out_b)
    for b in range(B):
        ref_b = max_damage_forward_ref(pr_b[b], mask_b[b], emb_table, base_powers)
        assert int(out_b[b, 0]) == int(ref_b), (b, int(out_b[b, 0]), int(ref_b))

    print("KERNEL_OK")
</pallas_src>

<mosaic_0001>
module attributes {stable_mosaic.version = 11 : i64} {
  func.func @_max_damage_kernel(%arg0: memref<1x108xi32, #tpu.memory_space<smem>>, %arg1: memref<1x4xi32, #tpu.memory_space<smem>>, %arg2: memref<64xf32, #tpu.memory_space<smem>>, %arg3: memref<1x1xi32, #tpu.memory_space<smem>>) attributes {dimension_semantics = [], scalar_prefetch = 0 : i64, scratch_operands = 0 : i64, tpu.core_type = #tpu.core_type<tc>} {
    %c-1_i32 = arith.constant -1 : i32
    %c0_i32 = arith.constant 0 : i32
    %c6_i32 = arith.constant 6 : i32
    %0 = arith.addi %c0_i32, %c6_i32 : i32
    %c1_i32 = arith.constant 1 : i32
    %1 = scf.for %arg4 = %c0_i32 to %0 step %c1_i32 iter_args(%arg5 = %c-1_i32) -> (i32)  : i32 {
      %c18_i32_38 = arith.constant 18 : i32
      %61 = arith.muli %arg4, %c18_i32_38 : i32
      %c1_i32_39 = arith.constant 1 : i32
      %62 = arith.addi %61, %c1_i32_39 : i32
      %c0_40 = arith.constant 0 : index
      %63 = arith.index_cast %62 : i32 to index
      %64 = memref.load %arg0[%c0_40, %63] : memref<1x108xi32, #tpu.memory_space<smem>>
      %c1_i32_41 = arith.constant 1 : i32
      %65 = arith.addi %64, %c1_i32_41 : i32
      %c2_i32_42 = arith.constant 2 : i32
      %66 = arith.cmpi eq, %65, %c2_i32_42 : i32
      %c0_i32_43 = arith.constant 0 : i32
      %67 = arith.cmpi slt, %arg5, %c0_i32_43 : i32
      %68 = arith.andi %67, %66 : i1
      %69 = arith.select %68, %arg4, %arg5 : i32
      scf.yield %69 : i32
    }
    %c6_i32_0 = arith.constant 6 : i32
    %c0_i32_1 = arith.constant 0 : i32
    %2 = arith.maxsi %1, %c0_i32_1 : i32
    %c18_i32 = arith.constant 18 : i32
    %3 = arith.muli %2, %c18_i32 : i32
    %c10_i32 = arith.constant 10 : i32
    %4 = arith.addi %3, %c10_i32 : i32
    %c0_i32_2 = arith.constant 0 : i32
    %5 = arith.addi %4, %c0_i32_2 : i32
    %c0 = arith.constant 0 : index
    %6 = arith.index_cast %5 : i32 to index
    %7 = memref.load %arg0[%c0, %6] : memref<1x108xi32, #tpu.memory_space<smem>>
    %c1_i32_3 = arith.constant 1 : i32
    %8 = arith.addi %7, %c1_i32_3 : i32
    %c0_i32_4 = arith.constant 0 : i32
    %9 = arith.maxsi %8, %c0_i32_4 : i32
    %c63_i32 = arith.constant 63 : i32
    %10 = arith.minsi %9, %c63_i32 : i32
    %11 = arith.index_cast %10 : i32 to index
    %12 = memref.load %arg2[%11] : memref<64xf32, #tpu.memory_space<smem>>
    %c0_5 = arith.constant 0 : index
    %c0_6 = arith.constant 0 : index
    %13 = memref.load %arg1[%c0_5, %c0_6] : memref<1x4xi32, #tpu.memory_space<smem>>
    %c0_i32_7 = arith.constant 0 : i32
    %14 = arith.cmpi ne, %13, %c0_i32_7 : i32
    %cst = arith.constant -1.000000e+00 : f32
    %15 = arith.select %14, %12, %cst : f32
    %cst_8 = arith.constant 0xFF800000 : f32
    %16 = arith.cmpf ogt, %15, %cst_8 : f32
    %c0_i32_9 = arith.constant 0 : i32
    %c0_i32_10 = arith.constant 0 : i32
    %17 = arith.select %16, %c0_i32_9, %c0_i32_10 : i32
    %cst_11 = arith.constant 0xFF800000 : f32
    %18 = arith.select %16, %15, %cst_11 : f32
    %c2_i32 = arith.constant 2 : i32
    %19 = arith.addi %4, %c2_i32 : i32
    %c0_12 = arith.constant 0 : index
    %20 = arith.index_cast %19 : i32 to index
    %21 = memref.load %arg0[%c0_12, %20] : memref<1x108xi32, #tpu.memory_space<smem>>
    %c1_i32_13 = arith.constant 1 : i32
    %22 = arith.addi %21, %c1_i32_13 : i32
    %c0_i32_14 = arith.constant 0 : i32
    %23 = arith.maxsi %22, %c0_i32_14 : i32
    %c63_i32_15 = arith.constant 63 : i32
    %24 = arith.minsi %23, %c63_i32_15 : i32
    %25 = arith.index_cast %24 : i32 to index
    %26 = memref.load %arg2[%25] : memref<64xf32, #tpu.memory_space<smem>>
    %c0_16 = arith.constant 0 : index
    %c1 = arith.constant 1 : index
    %27 = memref.load %arg1[%c0_16, %c1] : memref<1x4xi32, #tpu.memory_space<smem>>
    %c0_i32_17 = arith.constant 0 : i32
    %28 = arith.cmpi ne, %27, %c0_i32_17 : i32
    %cst_18 = arith.constant -1.000000e+00 : f32
    %29 = arith.select %28, %26, %cst_18 : f32
    %30 = arith.cmpf ogt, %29, %18 : f32
    %c1_i32_19 = arith.constant 1 : i32
    %31 = arith.select %30, %c1_i32_19, %17 : i32
    %32 = arith.select %30, %29, %18 : f32
    %c4_i32 = arith.constant 4 : i32
    %33 = arith.addi %4, %c4_i32 : i32
    %c0_20 = arith.constant 0 : index
    %34 = arith.index_cast %33 : i32 to index
    %35 = memref.load %arg0[%c0_20, %34] : memref<1x108xi32, #tpu.memory_space<smem>>
    %c1_i32_21 = arith.constant 1 : i32
    %36 = arith.addi %35, %c1_i32_21 : i32
    %c0_i32_22 = arith.constant 0 : i32
    %37 = arith.maxsi %36, %c0_i32_22 : i32
    %c63_i32_23 = arith.constant 63 : i32
    %38 = arith.minsi %37, %c63_i32_23 : i32
    %39 = arith.index_cast %38 : i32 to index
    %40 = memref.load %arg2[%39] : memref<64xf32, #tpu.memory_space<smem>>
    %c0_24 = arith.constant 0 : index
    %c2 = arith.constant 2 : index
    %41 = memref.load %arg1[%c0_24, %c2] : memref<1x4xi32, #tpu.memory_space<smem>>
    %c0_i32_25 = arith.constant 0 : i32
    %42 = arith.cmpi ne, %41, %c0_i32_25 : i32
    %cst_26 = arith.constant -1.000000e+00 : f32
    %43 = arith.select %42, %40, %cst_26 : f32
    %44 = arith.cmpf ogt, %43, %32 : f32
    %c2_i32_27 = arith.constant 2 : i32
    %45 = arith.select %44, %c2_i32_27, %31 : i32
    %46 = arith.select %44, %43, %32 : f32
    %c6_i32_28 = arith.constant 6 : i32
    %47 = arith.addi %4, %c6_i32_28 : i32
    %c0_29 = arith.constant 0 : index
    %48 = arith.index_cast %47 : i32 to index
    %49 = memref.load %arg0[%c0_29, %48] : memref<1x108xi32, #tpu.memory_space<smem>>
    %c1_i32_30 = arith.constant 1 : i32
    %50 = arith.addi %49, %c1_i32_30 : i32
    %c0_i32_31 = arith.constant 0 : i32
    %51 = arith.maxsi %50, %c0_i32_31 : i32
    %c63_i32_32 = arith.constant 63 : i32
    %52 = arith.minsi %51, %c63_i32_32 : i32
    %53 = arith.index_cast %52 : i32 to index
    %54 = memref.load %arg2[%53] : memref<64xf32, #tpu.memory_space<smem>>
    %c0_33 = arith.constant 0 : index
    %c3 = arith.constant 3 : index
    %55 = memref.load %arg1[%c0_33, %c3] : memref<1x4xi32, #tpu.memory_space<smem>>
    %c0_i32_34 = arith.constant 0 : i32
    %56 = arith.cmpi ne, %55, %c0_i32_34 : i32
    %cst_35 = arith.constant -1.000000e+00 : f32
    %57 = arith.select %56, %54, %cst_35 : f32
    %58 = arith.cmpf ogt, %57, %46 : f32
    %c3_i32 = arith.constant 3 : i32
    %59 = arith.select %58, %c3_i32, %45 : i32
    %c0_36 = arith.constant 0 : index
    %c0_37 = arith.constant 0 : index
    %60 = memref.load %arg3[%c0_36, %c0_37] : memref<1x1xi32, #tpu.memory_space<smem>>
    memref.store %59, %arg3[%c0_36, %c0_37] : memref<1x1xi32, #tpu.memory_space<smem>>
    return
  }
}

</mosaic_0001>

<bundles_post_ra>
// kernel: tpu_custom_call.1
= control target key start
LH: loop header
LB: loop body
LE: loop exit
PB: predicated region body
PF: predicated region fallthrough
CT: control target
= control target key end

     0   :  { %8 = vsyncpa [#allocation3], 0  ;;  %s322_s0 = inlined_call_operand.hbm [shape: s32[1,108], index: 0, kind: input, shape index: {}]   ;;  %s323_s1 = inlined_call_operand.hbm [shape: s32[1,4], index: 1, kind: input, shape index: {}]   ;;  %s324_s2 = inlined_call_operand.vmem [shape: f32[64], index: 2, kind: input, shape index: {}]   ;;  %s325_s3 = inlined_call_operand.hbm [shape: s32[1,1], index: 3, kind: output, shape index: {}]  }
   0x1   :  { %9 = vsyncpa [#allocation7], 0 }
   0x2   :  { %10 = vsyncpa [#allocation5], 0 }
   0x3   :  { %11 = vsyncpa [#allocation4], 0  ;;  %s17_s14 = sshll.u32 %s322_s0, 4  ;;  %s26_s17 = sshll.u32 %s323_s1, 4  ;;  %s18_s14 = int_to_ptr.hbm [resolvable:$true] %s17_s14  ;;  %s27_s17 = int_to_ptr.hbm [resolvable:$true] %s26_s17 }
   0x4   :  { %s277_s18 = smov [#allocation2]   ;;  %s278_s19 = smov [#allocation6]  }
   0x5   :  { %20 = dma.hbm_to_smem %s18_s14, 16, %s277_s18, [#allocation3]  }
   0x6   :  { %29 = dma.hbm_to_smem %s27_s17, 16, %s278_s19, [#allocation7]  }
   0x7   :  { %s35_s22 = sshll.u32 %s324_s2, 4  ;;  %s279_s23 = smov [#allocation8]   ;;  %s36_s22 = int_to_ptr.vmem [resolvable:$true] %s35_s22 }
   0x8   :  { %38 = dma.vmem_to_smem %s36_s22, 16, %s279_s23, [#allocation5]  }
   0x9   :  { %261 = dma.done.wait [#allocation3], 16  }
   0xa   :  { %262 = vsyncadd [#allocation3], 4294967280 }
   0xb   :  { %263 = dma.done.wait [#allocation7], 16  }
   0xc   :  { %264 = vsyncadd [#allocation7], 4294967280 }
   0xd   :  { %265 = dma.done.wait [#allocation5], 16  }
   0xe   :  { %266 = vsyncadd [#allocation5], 4294967280 }
   0xf   :  { %51 = sfence }
  0x10   :  { %s269_s0 = smov 4294967295   ;;  %s273_s1 = smov 0  }
  0x11 LB: > { %s59_s24 = smul.u32 18, %s275_s1  ;;  %p64_p0 = scmp.lt.s32.totalorder %s271_s0, 0  ;;  %s275_s1 = sphi %s273_s1, %s57_s1   ;;  %s271_s0 = sphi %s269_s0, %s270_s0  }
  0x13   : > { %s60_s25 = sadd.s32 1, %s59_s24 }
  0x14   : > { %s61_s26 = sld [smem:[#allocation2 + %s60_s25]] }
  0x1a   : > { %s62_s2 = sadd.s32 1, %s61_s26 }
  0x1b   : > { %p63_p1 = scmp.eq.s32.totalorder %s62_s2, 2 }
  0x1d   : > { %p65_p2 = pnand %p64_p0, %p63_p1 }
  0x1f   : > { %s153_s27 = scalar_select %p65_p2, %s271_s0, %s275_s1  }
  0x20   : > { %s57_s1 = sadd.s32 1, %s275_s1  }
  0x21   : > { %p54_p3 = scmp.ge.s32.totalorder %s57_s1, 6   ;;  %s270_s0 = smov %s153_s27  }
  0x22   :  { %p68_p4 = scmp.gt.s32.totalorder (%p54_p3), %s153_s27, 0  ;;  %s79_s6 = sld [smem:[#allocation6]] (%p54_p3) }
  0x23   :  { %56 = sbr.rel (!%p54_p3) target bundleno = 17 (0x11), region = 52  ;;  %s310_s8 = sld [smem:[#allocation6 + $0x1]] (%p54_p3) }
  0x24   :  { %s312_s9 = sld [smem:[#allocation6 + $0x2]] (%p54_p3)  ;;  %s132_s1 = sshll.u32 (%p54_p3), %s325_s3, 4  ;;  %s133_s1 = int_to_ptr.hbm [resolvable:$true] %s132_s1 }
  0x25   :  { %s314_s13 = sld [smem:[#allocation6 + $0x3]] (%p54_p3)  ;;  %s280_s24 = smov (%p54_p3), [#allocation9]  }
  0x28   :  { %s327_s27 = smov (!%p68_p4, %s153_s27), 0  ;;  %p80_p9 = scmp.ne.s32.totalorder %s79_s6, 0 }
  0x29   :  { %s70_s28 = smul.u32 18, %s327_s27  ;;  %p93_p12 = scmp.ne.s32.totalorder %s310_s8, 0 }
  0x2a   :  { %p107_p1 = scmp.ne.s32.totalorder %s312_s9, 0 }
  0x2b   :  { %s71_s29 = sadd.s32 10, %s70_s28  ;;  %s84_s4 = sadd.s32 12, %s70_s28 }
  0x2c   :  { %s72_s30 = sld [smem:[#allocation2 + %s71_s29]]  ;;  %s98_s7 = sadd.s32 14, %s70_s28 }
  0x2d   :  { %s85_s5 = sld [smem:[#allocation2 + %s84_s4]]  ;;  %s112_s11 = sadd.s32 16, %s70_s28 }
  0x2e   :  { %s99_s10 = sld [smem:[#allocation2 + %s98_s7]] }
  0x2f   :  { %s113_s15 = sld [smem:[#allocation2 + %s112_s11]] }
  0x32   :  { %s73_s12 = sadd.s32 1, %s72_s30 }
  0x33   :  { %p74_p5 = scmp.gt.s32.totalorder %s73_s12, 0  ;;  %p154_p6 = scmp.lt.s32.totalorder %s73_s12, 63 }
  0x34   :  { %s86_s14 = sadd.s32 1, %s85_s5  ;;  %s100_s17 = sadd.s32 1, %s99_s10 }
  0x35   :  { %s329_s12 = smov (!%p74_p5, %s73_s12), 0  ;;  %p87_p7 = scmp.gt.s32.totalorder %s86_s14, 0 }
  0x36   :  { %p159_p8 = scmp.lt.s32.totalorder %s86_s14, 63  ;;  %s331_s12 = smov (!%p154_p6, %s329_s12), 63 }
  0x37   :  { %s333_s14 = smov (!%p87_p7, %s86_s14), 0  ;;  %s78_s16 = sld [smem:[#allocation8 + %s331_s12]] }
  0x38   :  { %s335_s14 = smov (!%p159_p8, %s333_s14), 63  ;;  %p101_p10 = scmp.gt.s32.totalorder %s100_s17, 0 }
  0x39   :  { %s91_s18 = sld [smem:[#allocation8 + %s335_s14]]  ;;  %p165_p11 = scmp.lt.s32.totalorder %s100_s17, 63 }
  0x3a   :  { %s337_s17 = smov (!%p101_p10, %s100_s17), 0  ;;  %s114_s19 = sadd.s32 1, %s113_s15 }
  0x3b   :  { %s341_s17 = smov (!%p165_p11, %s337_s17), 63  ;;  %p115_p0 = scmp.gt.s32.totalorder %s114_s19, 0 }
  0x3c   :  { %s105_s20 = sld [smem:[#allocation8 + %s341_s17]]  ;;  %p171_p3 = scmp.lt.s32.totalorder %s114_s19, 63 }
  0x3d   :  { %s339_s16 = smov (!%p80_p9, %s78_s16), -1.0  ;;  %s347_s19 = smov (!%p115_p0, %s114_s19), 0 }
  0x3e   :  { %p82_p13 = scmp.gt.f32.partialorder %s339_s16, -inf  ;;  %s351_s19 = smov (!%p171_p3, %s347_s19), 63 }
  0x3f   :  { %s343_s18 = smov (!%p93_p12, %s91_s18), -1.0  ;;  %s119_s22 = sld [smem:[#allocation8 + %s351_s19]] }
  0x40   :  { %s345_s16 = smov (!%p82_p13, %s339_s16), -inf  ;;  %p121_p5 = scmp.ne.s32.totalorder %s314_s13, 0 }
  0x41   :  { %p95_p2 = scmp.gt.f32.partialorder %s343_s18, %s345_s16 }
  0x42   :  { %s353_s20 = smov (!%p107_p1, %s105_s20), -1.0 }
  0x43   :  { %s96_s21 = scalar_select %p95_p2, 1, 0 }
  0x44   :  { %s349_s18 = smov (!%p95_p2, %s343_s18), %s345_s16 }
  0x45   :  { %p109_p4 = scmp.gt.f32.partialorder %s353_s20, %s349_s18  ;;  %s359_s22 = smov (!%p121_p5, %s119_s22), -1.0 }
  0x47   :  { %s355_s20 = smov (!%p109_p4, %s353_s20), %s349_s18  ;;  %s357_s21 = smov (%p109_p4, %s96_s21), 2 }
  0x48   :  { %p123_p6 = scmp.gt.f32.partialorder %s359_s22, %s355_s20 }
  0x4a   :  { %s361_s21 = smov (%p123_p6, %s357_s21), 3 }
  0x4b   :  { %126 = sst [smem:[#allocation9]] %s361_s21 }
  0x4c   :  { %135 = dma.smem_to_hbm %s280_s24, 16, %s133_s1, [#allocation4]  }
  0x4d   :  { %267 = dma.done.wait [#allocation4], 16  }
  0x4e   :  { %268 = vsyncadd [#allocation4], 4294967280 }
  0x4f   :  { %140 = sfence }
  0x50   :  { %141 = vsyncpa [#allocation3], 1 }
  0x51   :  { %142 = vsyncpa [#allocation7], 1 }
  0x52   :  { %143 = vsyncpa [#allocation4], 1 }
  0x53   :  { %144 = vsyncpa [#allocation5], 1 }

</bundles_post_ra>
